<compile_context>
chip_gen: v7x
topology: tpu7x:2x2x1
jax: 0.10.0
libtpu: 0.0.40
codegen_flags: <defaults>
</compile_context>

<pallas_src>
import jax
import jax.numpy as jnp
from jax.experimental import pallas as pl
from jax.experimental.pallas import tpu as pltpu


def _round_up(n, m):
    return ((n + m - 1) // m) * m


# ----------------------------------------------------------------------------
# Kernel: x @ W1' + b1' -> ReLU -> @ W2 + b2 -> ReLU   (BN already folded)
# ----------------------------------------------------------------------------
def _mlp_encoder_kernel(x_ref, w1_ref, b1_ref, w2_ref, b2_ref, o_ref):
    # Linear 1 (BN folded into w1/b1): bf16 MXU matmul, f32 accumulation.
    h = jnp.dot(x_ref[...], w1_ref[...], preferred_element_type=jnp.float32)
    h = jnp.maximum(h + b1_ref[...], 0.0)            # bias + ReLU in f32 (VPU)

    # Dropout: identity in eval mode.

    # Linear 2: cast activations back to bf16 for the MXU, accumulate in f32.
    h2 = jnp.dot(h.astype(w2_ref.dtype), w2_ref[...],
                 preferred_element_type=jnp.float32)
    o_ref[...] = jnp.maximum(h2 + b2_ref[...], 0.0)  # bias + ReLU in f32


# ----------------------------------------------------------------------------
# One-time parameter preparation: fold eval-mode BN into Linear1, cast to bf16,
# pad feature dims to lane-dense multiples of 128.
# ----------------------------------------------------------------------------
def prepare_params(params, *, matmul_dtype=jnp.bfloat16, eps=1e-5):
    D_in, H = params["w1"].shape

    # Fold BatchNorm (running stats) into W1 / b1.
    scale = params["gamma"] * jax.lax.rsqrt(params["running_var"] + eps)   # (1, H)
    w1 = params["w1"] * scale
    b1 = (params["b1"] - params["running_mean"]) * scale + params["beta"]
    w2 = params["w2"]
    b2 = params["b2"]

    Dp = _round_up(D_in, 128)
    Hp = _round_up(H, 128)

    w1p = jnp.zeros((Dp, Hp), matmul_dtype).at[:D_in, :H].set(w1.astype(matmul_dtype))
    w2p = jnp.zeros((Hp, Hp), matmul_dtype).at[:H, :H].set(w2.astype(matmul_dtype))
    b1p = jnp.zeros((1, Hp), jnp.float32).at[:, :H].set(b1.astype(jnp.float32))
    b2p = jnp.zeros((1, Hp), jnp.float32).at[:, :H].set(b2.astype(jnp.float32))

    return dict(w1=w1p, b1=b1p, w2=w2p, b2=b2p,
                D_in=D_in, H=H, Dp=Dp, Hp=Hp, matmul_dtype=matmul_dtype)


# ----------------------------------------------------------------------------
# Wrapper
# ----------------------------------------------------------------------------
def mlp_encoder_v2(x, prepared, *, tile_b=256,
                   vmem_limit_bytes=64 * 1024 * 1024):
    """x: (B, D_in) float32.  prepared: output of prepare_params()."""
    B, D_in = x.shape
    assert D_in == prepared["D_in"]
    H, Dp, Hp = prepared["H"], prepared["Dp"], prepared["Hp"]
    mdt = prepared["matmul_dtype"]

    # Batch tiling: clamp tile to the (8-aligned) batch so tiny batches don't
    # over-pad; pad B up to a multiple of the tile (ragged-B handling).
    tile_b = min(tile_b, _round_up(B, 8))
    Bp = _round_up(B, tile_b)

    xp = jnp.zeros((Bp, Dp), mdt).at[:B, :D_in].set(x.astype(mdt))

    w1p, b1p, w2p, b2p = (prepared["w1"], prepared["b1"],
                          prepared["w2"], prepared["b2"])

    full = lambda shape: pl.BlockSpec(shape, lambda i: (0, 0))

    cost = pl.CostEstimate(
        flops=2 * Bp * (Dp * Hp + Hp * Hp),
        transcendentals=0,
        bytes_accessed=(xp.size * xp.dtype.itemsize
                        + w1p.size * w1p.dtype.itemsize
                        + w2p.size * w2p.dtype.itemsize
                        + (b1p.size + b2p.size + Bp * Hp) * 4),
    )

    out = pl.pallas_call(
        _mlp_encoder_kernel,
        out_shape=jax.ShapeDtypeStruct((Bp, Hp), jnp.float32),
        grid_spec=pltpu.PrefetchScalarGridSpec(
            num_scalar_prefetch=0,
            grid=(Bp // tile_b,),
            in_specs=[
                pl.BlockSpec((tile_b, Dp), lambda i: (i, 0)),   # x tile
                full((Dp, Hp)),                                 # folded W1 (bf16)
                full((1, Hp)),                                  # folded b1 (f32)
                full((Hp, Hp)),                                 # W2 (bf16)
                full((1, Hp)),                                  # b2 (f32)
            ],
            out_specs=pl.BlockSpec((tile_b, Hp), lambda i: (i, 0)),
        ),
        compiler_params=pltpu.CompilerParams(
            dimension_semantics=("parallel",),
            vmem_limit_bytes=vmem_limit_bytes),
        cost_estimate=cost,
    )(xp, w1p, b1p, w2p, b2p)

    return out[:B, :H]


# ----------------------------------------------------------------------------
# Parameter init (kernel layout: W stored as (in, out)) and pure-JAX reference
# ----------------------------------------------------------------------------
def init_params(key, input_dim, hidden_dim):
    k1, k2, k3, k4, k5, k6 = jax.random.split(key, 6)
    w1 = jax.random.normal(k1, (input_dim, hidden_dim), jnp.float32) * 0.1
    b1 = jax.random.normal(k2, (1, hidden_dim), jnp.float32) * 0.1
    w2 = jax.random.normal(k3, (hidden_dim, hidden_dim), jnp.float32) * 0.1
    b2 = jax.random.normal(k4, (1, hidden_dim), jnp.float32) * 0.1
    gamma = 1.0 + 0.1 * jax.random.normal(k5, (1, hidden_dim), jnp.float32)
    beta = 0.1 * jax.random.normal(k6, (1, hidden_dim), jnp.float32)
    running_mean = jnp.zeros((1, hidden_dim), jnp.float32)
    running_var = jnp.ones((1, hidden_dim), jnp.float32)
    return dict(w1=w1, b1=b1, w2=w2, b2=b2, gamma=gamma, beta=beta,
                running_mean=running_mean, running_var=running_var)


def mlp_encoder_v2_ref(x, p):
    """Pure-JAX f32 reference (eval-mode forward)."""
    h = x @ p["w1"] + p["b1"]
    h = (h - p["running_mean"]) * jax.lax.rsqrt(p["running_var"] + 1e-5) \
        * p["gamma"] + p["beta"]
    h = jnp.maximum(h, 0.0)
    h = h @ p["w2"] + p["b2"]
    return jnp.maximum(h, 0.0)


if __name__ == "__main__":
    key = jax.random.PRNGKey(0)
    kx, kp = jax.random.split(key)

    B, input_dim, hidden_dim = 8, 16, 32
    x = jax.random.normal(kx, (B, input_dim), jnp.float32)
    params = init_params(kp, input_dim, hidden_dim)

    prepared = prepare_params(params)                 # one-time BN fold + pad
    out = mlp_encoder_v2(x, prepared, tile_b=256)
    out = jax.block_until_ready(out)

    ref = mlp_encoder_v2_ref(x, params)
    assert out.shape == (B, hidden_dim)
    # bf16 MXU matmuls vs f32 reference -> slightly looser tolerance.
    assert jnp.allclose(out, ref, atol=3e-2, rtol=3e-2), "mismatch vs reference"

    print("KERNEL_OK")
</pallas_src>

<mosaic_0001>
module attributes {stable_mosaic.version = 11 : i64} {
  func.func @_mlp_encoder_kernel(%arg0: i32, %arg1: memref<8x128xbf16, #tpu.memory_space<vmem>>, %arg2: memref<128x128xbf16, #tpu.memory_space<vmem>>, %arg3: memref<1x128xf32, #tpu.memory_space<vmem>>, %arg4: memref<128x128xbf16, #tpu.memory_space<vmem>>, %arg5: memref<1x128xf32, #tpu.memory_space<vmem>>, %arg6: memref<8x128xf32, #tpu.memory_space<vmem>>) attributes {dimension_semantics = [#tpu.dimension_semantics<parallel>], iteration_bounds = array<i64: 1>, scalar_prefetch = 0 : i64, scratch_operands = 0 : i64, tpu.core_type = #tpu.core_type<tc>, window_params = [{transform_indices = @transform_0, window_bounds = array<i64: 8, 128>}, {pipeline_mode = #tpu.pipeline_mode<synchronous>, transform_indices = @transform_1, window_bounds = array<i64: 128, 128>}, {pipeline_mode = #tpu.pipeline_mode<synchronous>, transform_indices = @transform_2, window_bounds = array<i64: 1, 128>}, {pipeline_mode = #tpu.pipeline_mode<synchronous>, transform_indices = @transform_3, window_bounds = array<i64: 128, 128>}, {pipeline_mode = #tpu.pipeline_mode<synchronous>, transform_indices = @transform_4, window_bounds = array<i64: 1, 128>}, {transform_indices = @transform_5, window_bounds = array<i64: 8, 128>}]} {
    %c0 = arith.constant 0 : index
    %c0_0 = arith.constant 0 : index
    %0 = vector.load %arg1[%c0, %c0_0] : memref<8x128xbf16, #tpu.memory_space<vmem>>, vector<8x128xbf16>
    %c0_1 = arith.constant 0 : index
    %c0_2 = arith.constant 0 : index
    %1 = vector.load %arg2[%c0_1, %c0_2] : memref<128x128xbf16, #tpu.memory_space<vmem>>, vector<128x128xbf16>
    %cst = arith.constant dense<0.000000e+00> : vector<8x128xf32>
    %2 = tpu.matmul %0, %1, %cst {dimension_numbers = #tpu.dot_dimension_numbers<[1], [0], [0], [1], [0, 0, 1, 1], [], []>} : vector<8x128xbf16>, vector<128x128xbf16>, vector<8x128xf32> -> vector<8x128xf32>
    %c0_3 = arith.constant 0 : index
    %c0_4 = arith.constant 0 : index
    %3 = vector.load %arg3[%c0_3, %c0_4] : memref<1x128xf32, #tpu.memory_space<vmem>>, vector<1x128xf32>
    %4 = vector.broadcast %3 : vector<1x128xf32> to vector<8x128xf32>
    %5 = arith.addf %2, %4 : vector<8x128xf32>
    %cst_5 = arith.constant 0.000000e+00 : f32
    %6 = vector.broadcast %cst_5 : f32 to vector<8x128xf32>
    %7 = arith.maximumf %5, %6 : vector<8x128xf32>
    %8 = arith.truncf %7 : vector<8x128xf32> to vector<8x128xbf16>
    %c0_6 = arith.constant 0 : index
    %c0_7 = arith.constant 0 : index
    %9 = vector.load %arg4[%c0_6, %c0_7] : memref<128x128xbf16, #tpu.memory_space<vmem>>, vector<128x128xbf16>
    %cst_8 = arith.constant dense<0.000000e+00> : vector<8x128xf32>
    %10 = tpu.matmul %8, %9, %cst_8 {dimension_numbers = #tpu.dot_dimension_numbers<[1], [0], [0], [1], [0, 0, 1, 1], [], []>} : vector<8x128xbf16>, vector<128x128xbf16>, vector<8x128xf32> -> vector<8x128xf32>
    %c0_9 = arith.constant 0 : index
    %c0_10 = arith.constant 0 : index
    %11 = vector.load %arg5[%c0_9, %c0_10] : memref<1x128xf32, #tpu.memory_space<vmem>>, vector<1x128xf32>
    %12 = vector.broadcast %11 : vector<1x128xf32> to vector<8x128xf32>
    %13 = arith.addf %10, %12 : vector<8x128xf32>
    %cst_11 = arith.constant 0.000000e+00 : f32
    %14 = vector.broadcast %cst_11 : f32 to vector<8x128xf32>
    %15 = arith.maximumf %13, %14 : vector<8x128xf32>
    %c0_12 = arith.constant 0 : index
    %c0_13 = arith.constant 0 : index
    %16 = vector.load %arg6[%c0_12, %c0_13] : memref<8x128xf32, #tpu.memory_space<vmem>>, vector<8x128xf32>
    tpu.vector_store %arg6[%c0_12, %c0_13], %15 {strides = array<i32>} : memref<8x128xf32, #tpu.memory_space<vmem>>, vector<8x128xf32>,
    return
  }
  func.func @transform_0(%arg0: i32) -> (i32, i32) {
    %c0_i32 = arith.constant 0 : i32
    %c0_i32_0 = arith.constant 0 : i32
    return %arg0, %c0_i32 : i32, i32
  }
  func.func @transform_1(%arg0: i32) -> (i32, i32) {
    %c0_i32 = arith.constant 0 : i32
    %c0_i32_0 = arith.constant 0 : i32
    %c0_i32_1 = arith.constant 0 : i32
    return %c0_i32, %c0_i32_0 : i32, i32
  }
  func.func @transform_2(%arg0: i32) -> (i32, i32) {
    %c0_i32 = arith.constant 0 : i32
    %c0_i32_0 = arith.constant 0 : i32
    %c0_i32_1 = arith.constant 0 : i32
    return %c0_i32, %c0_i32_0 : i32, i32
  }
  func.func @transform_3(%arg0: i32) -> (i32, i32) {
    %c0_i32 = arith.constant 0 : i32
    %c0_i32_0 = arith.constant 0 : i32
    %c0_i32_1 = arith.constant 0 : i32
    return %c0_i32, %c0_i32_0 : i32, i32
  }
  func.func @transform_4(%arg0: i32) -> (i32, i32) {
    %c0_i32 = arith.constant 0 : i32
    %c0_i32_0 = arith.constant 0 : i32
    %c0_i32_1 = arith.constant 0 : i32
    return %c0_i32, %c0_i32_0 : i32, i32
  }
  func.func @transform_5(%arg0: i32) -> (i32, i32) {
    %c0_i32 = arith.constant 0 : i32
    %c0_i32_0 = arith.constant 0 : i32
    return %arg0, %c0_i32 : i32, i32
  }
}

</mosaic_0001>

<bundles_post_ra>
// kernel: tpu_custom_call.1
= control target key start
LH: loop header
LB: loop body
LE: loop exit
PB: predicated region body
PF: predicated region fallthrough
CT: control target
= control target key end

     0   :  { %10 = vsyncpa [#allocation3], 0  ;;  %s682_s0 = inlined_call_operand.hbm [shape: bf16[8,128], index: 0, kind: input, shape index: {}]   ;;  %s683_s1 = inlined_call_operand.hbm [shape: bf16[128,128], index: 1, kind: input, shape index: {}]   ;;  %s684_s2 = inlined_call_operand.hbm [shape: f32[1,128], index: 2, kind: input, shape index: {}]   ;;  %s685_s3 = inlined_call_operand.hbm [shape: bf16[128,128], index: 3, kind: input, shape index: {}]   ;;  %s686_s4 = inlined_call_operand.hbm [shape: f32[1,128], index: 4, kind: input, shape index: {}]   ;;  %s687_s5 = inlined_call_operand.hbm [shape: f32[8,128], index: 5, kind: output, shape index: {}]  }
   0x1   :  { %11 = vsyncpa [#allocation6], 0 }
   0x2   :  { %12 = vsyncpa [#allocation9], 0 }
   0x3   :  { %13 = vsyncpa [#allocation4], 0  ;;  %s570_s18 = smov [#allocation5]   ;;  %s430_s22 = scalar_lea.hbm %s683_s1, 1024 }
   0x4   :  { %s29_s19 = sshll.u32 %s570_s18, 4  ;;  %p431_p0 = scmp.ne.s32.totalorder %s683_s1, %s430_s22  ;;  %s30_s19 = int_to_ptr.vmem [resolvable:$true] %s29_s19 }
   0x5   :  { %p434_p1 = scmp.lt.u32.totalorder %s430_s22, %s683_s1 }
   0x7   :  { %p436_p2 = pnand %p434_p1, %p431_p0 }
   0x9   :  { %439 = shalt.err (!%p436_p2)
}
   0xa   :  { %s440_s27 = scalar_lea.vmem %s30_s19, 1024  ;;  %p445_p4 = scmp.lt.s32.totalorder %s30_s19, %s30_s19 }
   0xb   :  { %p441_p3 = scmp.ne.s32.totalorder %s30_s19, %s440_s27  ;;  %p446_p5 = scmp.lt.s32.totalorder %s440_s27, %s440_s27 }
   0xd   :  { %p447_p6 = por %p446_p5, %p445_p4 }
   0xf   :  { %p448_p7 = pnand %p447_p6, %p441_p3 }
  0x11   :  { %451 = shalt.err (!%p448_p7)
}
  0x12   :  { %s571_s28 = smov 64   ;;  %s572_s29 = smov 4  }
  0x13   :  { %35 = dma.hbm_to_vmem [thread:$0]  %s683_s1, 1024, %s30_s19, [#allocation6], %s571_s28, %s571_s28, %s572_s29  }
  0x14   :  { %s573_s7 = smov [#allocation8]   ;;  %s574_s9 = smov [#allocation2]  }
  0x15   :  { %s51_s8 = sshll.u32 %s573_s7, 4  ;;  %s20_s10 = sshll.u32 %s574_s9, 4  ;;  %s52_s8 = int_to_ptr.vmem [resolvable:$true] %s51_s8  ;;  %s21_s10 = int_to_ptr.vmem [resolvable:$true] %s20_s10 }
  0x16   :  { %s452_s13 = scalar_lea.hbm %s685_s3, 1024 }
  0x17   :  { %p453_p8 = scmp.ne.s32.totalorder %s685_s3, %s452_s13  ;;  %p456_p9 = scmp.lt.u32.totalorder %s452_s13, %s685_s3 }
  0x19   :  { %p458_p10 = pnand %p456_p9, %p453_p8 }
  0x1b   :  { %461 = shalt.err (!%p458_p10)
}
  0x1c   :  { %s462_s1 = scalar_lea.vmem %s52_s8, 1024  ;;  %p467_p12 = scmp.lt.s32.totalorder %s52_s8, %s52_s8 }
  0x1d   :  { %p463_p11 = scmp.ne.s32.totalorder %s52_s8, %s462_s1  ;;  %p468_p13 = scmp.lt.s32.totalorder %s462_s1, %s462_s1 }
  0x1f   :  { %p469_p0 = por %p468_p13, %p467_p12 }
  0x21   :  { %p470_p1 = pnand %p469_p0, %p463_p11 }
  0x23   :  { %473 = shalt.err (!%p470_p1)
}
  0x24   :  { %57 = dma.hbm_to_vmem [thread:$0]  %s685_s3, 1024, %s52_s8, [#allocation9], %s571_s28, %s571_s28, %s572_s29  }
  0x25   :  { %s474_s22 = scalar_lea.hbm %s682_s0, 64 }
  0x26   :  { %p475_p2 = scmp.ne.s32.totalorder %s682_s0, %s474_s22  ;;  %p478_p3 = scmp.lt.u32.totalorder %s474_s22, %s682_s0 }
  0x28   :  { %p480_p4 = pnand %p478_p3, %p475_p2 }
  0x2a   :  { %483 = shalt.err (!%p480_p4)
}
  0x2b   :  { %s484_s27 = scalar_lea.vmem %s21_s10, 64  ;;  %p489_p6 = scmp.lt.s32.totalorder %s21_s10, %s21_s10 }
  0x2c   :  { %p485_p5 = scmp.ne.s32.totalorder %s21_s10, %s484_s27  ;;  %p490_p7 = scmp.lt.s32.totalorder %s484_s27, %s484_s27 }
  0x2e   :  { %p491_p8 = por %p490_p7, %p489_p6 }
  0x30   :  { %p492_p9 = pnand %p491_p8, %p485_p5 }
  0x32   :  { %495 = shalt.err (!%p492_p9)
}
  0x33   :  { %23 = dma.hbm_to_vmem [thread:$0]  %s682_s0, 64, %s21_s10, [#allocation3]  }
  0x34   :  { %s575_s29 = smov [#allocation7]   ;;  %s576_s6 = smov [#allocation10]  }
  0x35   :  { %s42_s30 = sshll.u32 %s575_s29, 4  ;;  %s64_s7 = sshll.u32 %s576_s6, 4  ;;  %s43_s30 = int_to_ptr.vmem [resolvable:$true] %s42_s30  ;;  %s65_s7 = int_to_ptr.vmem [resolvable:$true] %s64_s7 }
  0x36   :  { %s496_s11 = scalar_lea.hbm %s684_s2, 16 }
  0x37   :  { %p497_p10 = scmp.ne.s32.totalorder %s684_s2, %s496_s11  ;;  %p500_p11 = scmp.lt.u32.totalorder %s496_s11, %s684_s2 }
  0x39   :  { %p502_p12 = pnand %p500_p11, %p497_p10 }
  0x3b   :  { %505 = shalt.err (!%p502_p12)
}
  0x3c   :  { %s506_s0 = scalar_lea.vmem %s43_s30, 16  ;;  %s510_s10 = scalar_lea.vmem %s43_s30, 32 }
  0x3d   :  { %p507_p13 = scmp.ne.s32.totalorder %s43_s30, %s506_s0  ;;  %p511_p0 = scmp.lt.s32.totalorder %s43_s30, %s43_s30 }
  0x3e   :  { %p512_p1 = scmp.lt.s32.totalorder %s510_s10, %s506_s0 }
  0x40   :  { %p513_p2 = por %p512_p1, %p511_p0 }
  0x42   :  { %p514_p3 = pnand %p513_p2, %p507_p13 }
  0x44   :  { %517 = shalt.err (!%p514_p3)
}
  0x45   :  { %45 = dma.hbm_to_vmem [thread:$0]  %s684_s2, 16, %s43_s30, [#allocation6]  }
  0x46   :  { %s518_s19 = scalar_lea.hbm %s686_s4, 16 }
  0x47   :  { %p519_p4 = scmp.ne.s32.totalorder %s686_s4, %s518_s19  ;;  %p522_p5 = scmp.lt.u32.totalorder %s518_s19, %s686_s4 }
  0x49   :  { %p524_p6 = pnand %p522_p5, %p519_p4 }
  0x4b   :  { %527 = shalt.err (!%p524_p6)
}
  0x4c   :  { %s528_s24 = scalar_lea.vmem %s65_s7, 16  ;;  %s532_s25 = scalar_lea.vmem %s65_s7, 32 }
  0x4d   :  { %p529_p7 = scmp.ne.s32.totalorder %s65_s7, %s528_s24  ;;  %p533_p8 = scmp.lt.s32.totalorder %s65_s7, %s65_s7 }
  0x4e   :  { %p534_p9 = scmp.lt.s32.totalorder %s532_s25, %s528_s24 }
  0x50   :  { %p535_p10 = por %p534_p9, %p533_p8 }
  0x52   :  { %p536_p11 = pnand %p535_p10, %p529_p7 }
  0x54   :  { %539 = shalt.err (!%p536_p11)
}
  0x55   :  { %67 = dma.hbm_to_vmem [thread:$0]  %s686_s4, 16, %s65_s7, [#allocation9]  }
  0x56   :  { %562 = dma.done.wait [#allocation3], 64  }
  0x57   :  { %563 = vsyncadd [#allocation3], 4294967232 }
  0x58   :  { %564 = dma.done.wait [#allocation6], 1040  }
  0x59   :  { %565 = vsyncadd [#allocation6], 4294966256 }
  0x5a   :  { %566 = dma.done.wait [#allocation9], 1040  }
  0x5b   :  { %567 = vsyncadd [#allocation9], 4294966256  ;;  %v577_v0 = vmov 0.0   ;;  %vm578_vm0 = vmmov 0   ;;  %v414_v1 = vld [vmem:[#allocation5] sm:$0xff]   ;;  %v415_v2 = vld [vmem:[#allocation5 + $0x8] sm:$0xff]  }
  0x5c   :  { %364 = vmatprep.subr.bf16.mxu0 %v577_v0  ;;  %380 = vmatprep.mubr.msk.bf16.mxu0 %vm578_vm0, %v577_v0  ;;  %v416_v3 = vld [vmem:[#allocation5 + $0x10] sm:$0xff]   ;;  %v422_v4 = vld [vmem:[#allocation8] sm:$0xff]   ;;  %v417_v5 = vld [vmem:[#allocation5 + $0x18] sm:$0xff]   ;;  %s579_s4 = smov [#allocation11]  }
  0x5d   :  { %384 = vmatprep.subr.bf16.mxu1 %v577_v0  ;;  %400 = vmatprep.mubr.msk.bf16.mxu1 %vm578_vm0, %v577_v0  ;;  %v423_v6 = vld [vmem:[#allocation8 + $0x8] sm:$0xff]   ;;  %v418_v7 = vld [vmem:[#allocation5 + $0x20] sm:$0xff]   ;;  %v424_v8 = vld [vmem:[#allocation8 + $0x10] sm:$0xff]   ;;  %s317_s27 = sshll.u32 %s579_s4, 4  ;;  %s318_s27 = int_to_ptr.vmem [resolvable:$true] %s317_s27 }
  0x5e   :  { %365 = vmatpush3.bf16.msra.mxu0 %v414_v1  ;;  %385 = vmatpush3.bf16.msra.mxu1 %v422_v4  ;;  %v419_v9 = vld [vmem:[#allocation5 + $0x28] sm:$0xff]   ;;  %v425_v10 = vld [vmem:[#allocation8 + $0x18] sm:$0xff]   ;;  %v420_v11 = vld [vmem:[#allocation5 + $0x30] sm:$0xff]   ;;  %s540_s3 = scalar_lea.vmem %s318_s27, 128  ;;  %p545_p13 = scmp.lt.s32.totalorder %s318_s27, %s318_s27 }
  0x5f   :  { %366 = vmatprep.subr.bf16.mxu0 %v577_v0  ;;  %386 = vmatprep.subr.bf16.mxu1 %v577_v0  ;;  %v426_v12 = vld [vmem:[#allocation8 + $0x20] sm:$0xff]   ;;  %v421_v13 = vld [vmem:[#allocation5 + $0x38] sm:$0xff]   ;;  %v427_v14 = vld [vmem:[#allocation8 + $0x28] sm:$0xff]   ;;  %p541_p12 = scmp.ne.s32.totalorder %s318_s27, %s540_s3  ;;  %p546_p0 = scmp.lt.s32.totalorder %s540_s3, %s540_s3 }
  0x60   :  { %v84_v15 = vld [vmem:[#allocation2] sm:$0xf]  ;;  %v428_v16 = vld [vmem:[#allocation8 + $0x30] sm:$0xff]   ;;  %v328_v18 = vld [vmem:[#allocation7] ss:$0 sm:$0xff] }
  0x61   :  { %v429_v17 = vld [vmem:[#allocation8 + $0x38] sm:$0xff]   ;;  %v337_v26 = vld [vmem:[#allocation10] ss:$0 sm:$0xff]  ;;  %p547_p1 = por %p546_p0, %p545_p13 }
  0x62   :  { %367 = vmatpush3.bf16.msra.mxu0 %v415_v2  ;;  %387 = vmatpush3.bf16.msra.mxu1 %v423_v6 }
  0x63   :  { %368 = vmatprep.subr.bf16.mxu0 %v577_v0  ;;  %388 = vmatprep.subr.bf16.mxu1 %v577_v0  ;;  %p548_p2 = pnand %p547_p1, %p541_p12 }
  0x66   :  { %369 = vmatpush3.bf16.msra.mxu0 %v416_v3  ;;  %389 = vmatpush3.bf16.msra.mxu1 %v424_v8 }
  0x67   :  { %370 = vmatprep.subr.bf16.mxu0 %v577_v0  ;;  %390 = vmatprep.subr.bf16.mxu1 %v577_v0 }
  0x6a   :  { %371 = vmatpush3.bf16.msra.mxu0 %v417_v5  ;;  %391 = vmatpush3.bf16.msra.mxu1 %v425_v10 }
  0x6b   :  { %372 = vmatprep.subr.bf16.mxu0 %v577_v0  ;;  %392 = vmatprep.subr.bf16.mxu1 %v577_v0 }
  0x6e   :  { %373 = vmatpush3.bf16.msra.mxu0 %v418_v7  ;;  %393 = vmatpush3.bf16.msra.mxu1 %v426_v12 }
  0x6f   :  { %374 = vmatprep.subr.bf16.mxu0 %v577_v0  ;;  %394 = vmatprep.subr.bf16.mxu1 %v577_v0 }
  0x72   :  { %375 = vmatpush3.bf16.msra.mxu0 %v419_v9  ;;  %395 = vmatpush3.bf16.msra.mxu1 %v427_v14 }
  0x73   :  { %376 = vmatprep.subr.bf16.mxu0 %v577_v0  ;;  %396 = vmatprep.subr.bf16.mxu1 %v577_v0 }
  0x76   :  { %377 = vmatpush3.bf16.msra.mxu0 %v420_v11  ;;  %397 = vmatpush3.bf16.msra.mxu1 %v428_v16 }
  0x77   :  { %378 = vmatprep.subr.bf16.mxu0 %v577_v0  ;;  %398 = vmatprep.subr.bf16.mxu1 %v577_v0 }
  0x7a   :  { %379 = vmatpush3.bf16.msra.mxu0 %v421_v13  ;;  %399 = vmatpush3.bf16.msra.mxu1 %v429_v17 }
  0x7d   :  { %381 = vmatmul.mubr.bf16.vlgmr.msra.gmra.mrb[0].mxu0 %v84_v15 }
 0x150   :  { %v190_v19 = vpop.f32.mrb[0].mxu0 }
 0x151   :  { %v191_v20 = vadd.f32 %v328_v18, %v190_v19  ;;  %v382_v21 = vpop.f32.mrb[1].mxu0 }
 0x152   :  { %v193_v22 = vpop.f32.mrb[2].mxu0 }
 0x153   :  { %v196_v23 = vmax.f32 %v191_v20, 0.0  ;;  %v383_v24 = vpop.f32.mrb[3].mxu0 }
 0x155   :  { %v197_v25 = vpack.c.bf16 %v196_v23, %v196_v23 }
 0x157   :  { %401 = vmatmul.mubr.bf16.vlgmr.msra.gmra.mrb[0].mxu1 %v197_v25 }
 0x22a   :  { %v303_v27 = vpop.f32.mrb[0].mxu1 }
 0x22b   :  { %v304_v28 = vadd.f32 %v337_v26, %v303_v27  ;;  %v402_v29 = vpop.f32.mrb[1].mxu1 }
 0x22c   :  { %v306_v30 = vpop.f32.mrb[2].mxu1 }
 0x22d   :  { %v309_v31 = vmax.f32 %v304_v28, 0.0  ;;  %v403_v32 = vpop.f32.mrb[3].mxu1 }
 0x22f   :  { %310 = vst [vmem:[#allocation11] sm:$0xff] %v309_v31 }
 0x230   :  { %551 = shalt.err (!%p548_p2)
}
 0x231   :  { %s552_s30 = scalar_lea.hbm %s687_s5, 128 }
 0x232   :  { %p553_p3 = scmp.ne.s32.totalorder %s687_s5, %s552_s30  ;;  %p556_p4 = scmp.lt.u32.totalorder %s552_s30, %s687_s5 }
 0x234   :  { %p558_p5 = pnand %p556_p4, %p553_p3 }
 0x236   :  { %561 = shalt.err (!%p558_p5)
}
 0x237   :  { %320 = dma.vmem_to_hbm [thread:$0]  %s318_s27, 128, %s687_s5, [#allocation4]  }
 0x238   :  { %568 = dma.done.wait [#allocation4], 128  }
 0x239   :  { %569 = vsyncadd [#allocation4], 4294967168 }
 0x23a   :  { %324 = vsyncpa [#allocation3], 1 }
 0x23b   :  { %325 = vsyncpa [#allocation6], 1 }
 0x23c   :  { %326 = vsyncpa [#allocation9], 1 }
 0x23d   :  { %327 = vsyncpa [#allocation4], 1 }

</bundles_post_ra>
